<compile_context>
chip_gen: v7x
topology: tpu7x:2x2x1
jax: 0.10.0
libtpu: 0.0.40
codegen_flags: <defaults>
</compile_context>

<pallas_src>
import functools

import jax
import jax.numpy as jnp
from jax.experimental import pallas as pl
from jax.experimental.pallas import tpu as pltpu

_BN_EPS = 1e-3  # matches nn.BatchNorm2d(eps=0.001)


# ----------------------------------------------------------------------------
# Fused CSPLayer kernel.  One grid step processes one image, entirely in VMEM.
# Activation layout inside the kernel: (H, W*C)  (row = sublane, W*C = lanes).
# ----------------------------------------------------------------------------
def _csp_fused_kernel(x_ref, sd_ref, su_ref,
                      wm_ref, bm_ref, ws_ref, bs_ref,
                      w1_ref, b1_ref, w2_ref, b2_ref,
                      wfa_ref, wfb_ref, bf_ref,
                      o_ref, *, num_blocks, add_identity):
    f32 = jnp.float32
    bf16 = jnp.bfloat16

    def mm(a, w):  # bf16 x bf16 -> f32 accumulate on the MXU
        return jnp.dot(a, w, preferred_element_type=f32)

    def conv_bn_silu(a16, w, b):  # folded-BN 1x1 conv + SiLU (f32 math)
        y = mm(a16, w) + b
        return y * jax.nn.sigmoid(y)

    x16 = x_ref[0]          # (H, W*Cin)  bf16
    sd = sd_ref[...]        # (H, H) bf16: (sd @ h)[r] = h[r-1] (zero at r=0)
    su = su_ref[...]        # (H, H) bf16: (su @ h)[r] = h[r+1] (zero at r=H-1)

    x_main = conv_bn_silu(x16, wm_ref[...], bm_ref[...])     # (H, W*mid) f32
    x_short = conv_bn_silu(x16, ws_ref[...], bs_ref[...])    # (H, W*mid) f32

    for blk in range(num_blocks):
        # DarknetBottleneck: 1x1 conv -> 3x3 conv -> (+ identity)
        h16 = conv_bn_silu(x_main.astype(bf16), w1_ref[blk],
                           b1_ref[blk]).astype(bf16)          # (H, W*hid)
        h_up = mm(sd, h16).astype(bf16)   # row r holds h[r-1]  (dy = -1 taps)
        h_dn = mm(su, h16).astype(bf16)   # row r holds h[r+1]  (dy = +1 taps)
        acc = mm(h_up, w2_ref[3 * blk + 0])
        acc = acc + mm(h16, w2_ref[3 * blk + 1])
        acc = acc + mm(h_dn, w2_ref[3 * blk + 2])
        y = acc + b2_ref[blk]
        y = y * jax.nn.sigmoid(y)
        x_main = (y + x_main) if add_identity else y

    # final 1x1 conv on the virtual concat [x_main, x_short] (split weights)
    out = mm(x_main.astype(bf16), wfa_ref[...])
    out = out + mm(x_short.astype(bf16), wfb_ref[...])
    out = out + bf_ref[...]
    out = out * jax.nn.sigmoid(out)
    o_ref[0] = out.astype(o_ref.dtype)


# ----------------------------------------------------------------------------
# Offline parameter packing: fold BN scale into the weights and expand them
# into the lane-dense (W*Cin, W*Cout) block-diagonal / banded form.
# ----------------------------------------------------------------------------
def _fold_pw(w, scale, bias, width):
    """1x1 conv (cin,cout) + BN scale -> block-diag (W*cin, W*cout) bf16."""
    ws = (w * scale[None, :]).astype(jnp.float32)
    wk = jnp.kron(jnp.eye(width, dtype=jnp.float32), ws)
    bk = jnp.tile(bias, width).reshape(1, -1)
    return wk.astype(jnp.bfloat16), bk.astype(jnp.float32)


def _fold_conv3(w3, scale, bias, width):
    """3x3 conv (3,3,cin,cout) + BN scale -> 3 banded (W*cin, W*cout) bf16
    matrices (one per dy).  dx shifts and W-direction SAME zero padding are
    folded into the band structure."""
    cin, cout = w3.shape[2], w3.shape[3]
    bands = []
    for dy in range(3):
        band = jnp.zeros((width * cin, width * cout), jnp.float32)
        for dx in range(3):
            shift = jnp.eye(width, width, 1 - dx, dtype=jnp.float32)
            band = band + jnp.kron(shift,
                                   (w3[dy, dx] * scale[None, :]).astype(jnp.float32))
        bands.append(band.astype(jnp.bfloat16))
    bk = jnp.tile(bias, width).reshape(1, -1).astype(jnp.float32)
    return jnp.stack(bands), bk


def pack_csp_params(params, width, *, num_blocks=1):
    wm, sm, bm = params["main_conv"]
    wsc, ssc, bsc = params["short_conv"]
    wf, sf, bff = params["final_conv"]
    mid = wm.shape[1]

    wm_p, bm_p = _fold_pw(wm, sm, bm, width)
    ws_p, bs_p = _fold_pw(wsc, ssc, bsc, width)
    wfa_p, bf_p = _fold_pw(wf[:mid], sf, bff, width)        # x_main half
    wfb_p, _ = _fold_pw(wf[mid:], sf, jnp.zeros_like(bff), width)  # x_short half

    w1l, b1l, w2l, b2l = [], [], [], []
    for i in range(num_blocks):
        w1, s1, b1 = params[f"block{i}_conv1"]
        w3, s2, b2 = params[f"block{i}_conv2"]
        w1p, b1p = _fold_pw(w1, s1, b1, width)
        w2p, b2p = _fold_conv3(w3, s2, b2, width)
        w1l.append(w1p), b1l.append(b1p), w2l.append(w2p), b2l.append(b2p)

    return dict(
        wm=wm_p, bm=bm_p, ws=ws_p, bs=bs_p,
        w1=jnp.stack(w1l),                  # (nb, W*mid, W*hid)
        b1=jnp.stack(b1l),                  # (nb, 1, W*hid)
        w2=jnp.concatenate(w2l, axis=0),    # (nb*3, W*hid, W*mid)
        b2=jnp.stack(b2l),                  # (nb, 1, W*mid)
        wfa=wfa_p, wfb=wfb_p, bf=bf_p,
    )


# ----------------------------------------------------------------------------
# Public forward: NCHW in / NCHW out (PyTorch convention).
# ----------------------------------------------------------------------------
def csp_layer_forward(x_nchw, packed, *, num_blocks=1, add_identity=True):
    N, Cin, H, W = x_nchw.shape
    WCin = W * Cin
    WCout = packed["wfa"].shape[1]
    Cout = WCout // W

    # layout plumbing only: NCHW -> (N, H, W*C) channel-fastest lane packing
    x = jnp.transpose(x_nchw, (0, 2, 3, 1)).reshape(N, H, WCin)
    x = x.astype(jnp.bfloat16)

    # tiny row-shift matrices for the 3x3 conv's dy taps (exact 0/1 values)
    sdown = jnp.eye(H, H, -1, dtype=jnp.bfloat16)   # row r <- row r-1
    sup = jnp.eye(H, H, 1, dtype=jnp.bfloat16)      # row r <- row r+1

    def _const_spec(arr):
        zeros = (0,) * arr.ndim
        return pl.BlockSpec(arr.shape, lambda n, _z=zeros: _z)

    args = (x, sdown, sup,
            packed["wm"], packed["bm"], packed["ws"], packed["bs"],
            packed["w1"], packed["b1"], packed["w2"], packed["b2"],
            packed["wfa"], packed["wfb"], packed["bf"])

    in_specs = [pl.BlockSpec((1, H, WCin), lambda n: (n, 0, 0))]
    in_specs += [_const_spec(a) for a in args[1:]]

    kern = functools.partial(_csp_fused_kernel, num_blocks=num_blocks,
                             add_identity=add_identity)

    out = pl.pallas_call(
        kern,
        out_shape=jax.ShapeDtypeStruct((N, H, WCout), jnp.float32),
        grid_spec=pltpu.PrefetchScalarGridSpec(
            num_scalar_prefetch=0,
            grid=(N,),
            in_specs=in_specs,
            out_specs=pl.BlockSpec((1, H, WCout), lambda n: (n, 0, 0)),
        ),
        compiler_params=pltpu.CompilerParams(
            dimension_semantics=("parallel",)),
    )(*args)

    return jnp.transpose(out.reshape(N, H, W, Cout), (0, 3, 1, 2))


# ----------------------------------------------------------------------------
# Deterministic parameter init (raw conv weights + folded BN scale/bias).
# ----------------------------------------------------------------------------
def _make_conv_bn(key, cin, cout, ksize):
    k_w, k_g, k_b, k_m, k_v = jax.random.split(key, 5)
    if ksize == 1:
        w = jax.random.normal(k_w, (cin, cout), jnp.float32) / jnp.sqrt(cin)
    else:
        w = jax.random.normal(k_w, (3, 3, cin, cout),
                              jnp.float32) / jnp.sqrt(cin * 9.0)
    gamma = 1.0 + 0.1 * jax.random.normal(k_g, (cout,), jnp.float32)
    beta = 0.1 * jax.random.normal(k_b, (cout,), jnp.float32)
    mean = 0.1 * jax.random.normal(k_m, (cout,), jnp.float32)
    var = jax.random.uniform(k_v, (cout,), jnp.float32, minval=0.5, maxval=1.5)
    scale = gamma / jnp.sqrt(var + _BN_EPS)
    bias = beta - mean * scale
    return w, scale, bias


def init_csp_params(key, in_channels, out_channels, expand_ratio=0.5,
                    num_blocks=1):
    mid = int(out_channels * expand_ratio)
    keys = jax.random.split(key, 3 + 2 * num_blocks)
    params = {
        "main_conv": _make_conv_bn(keys[0], in_channels, mid, 1),
        "short_conv": _make_conv_bn(keys[1], in_channels, mid, 1),
        "final_conv": _make_conv_bn(keys[2], 2 * mid, out_channels, 1),
    }
    for i in range(num_blocks):
        hidden = int(mid * 1.0)  # DarknetBottleneck expansion = 1.0
        params[f"block{i}_conv1"] = _make_conv_bn(keys[3 + 2 * i], mid,
                                                  hidden, 1)
        params[f"block{i}_conv2"] = _make_conv_bn(keys[4 + 2 * i], hidden,
                                                  mid, 3)
    return params


# ----------------------------------------------------------------------------
# Pure-JAX reference (uses the raw, un-packed params).
# ----------------------------------------------------------------------------
def _ref_pw(x, w, s, b):
    y = jnp.einsum("nhwc,cd->nhwd", x, w) * s + b
    return y * jax.nn.sigmoid(y)


def _ref_conv3(x, w3, s, b):
    y = jax.lax.conv_general_dilated(
        x, w3, (1, 1), "SAME", dimension_numbers=("NHWC", "HWIO", "NHWC"))
    y = y * s + b
    return y * jax.nn.sigmoid(y)


def csp_layer_ref(x_nchw, params, *, num_blocks=1, add_identity=True):
    x = jnp.transpose(x_nchw, (0, 2, 3, 1))
    xs = _ref_pw(x, *params["short_conv"])
    xm = _ref_pw(x, *params["main_conv"])
    for i in range(num_blocks):
        h = _ref_pw(xm, *params[f"block{i}_conv1"])
        y = _ref_conv3(h, *params[f"block{i}_conv2"])
        xm = y + xm if add_identity else y
    cat = jnp.concatenate([xm, xs], axis=-1)
    out = _ref_pw(cat, *params["final_conv"])
    return jnp.transpose(out, (0, 3, 1, 2))


if __name__ == "__main__":
    key = jax.random.PRNGKey(0)
    k_x, k_p = jax.random.split(key)

    # CSPLayer(in_channels=4, out_channels=4): expand_ratio=0.5 -> mid=2,
    # num_blocks=1, add_identity=True
    N, C, H, W = 2, 4, 16, 16
    x = jax.random.normal(k_x, (N, C, H, W), jnp.float32)
    params = init_csp_params(k_p, in_channels=C, out_channels=C,
                             expand_ratio=0.5, num_blocks=1)
    packed = pack_csp_params(params, W, num_blocks=1)

    out = csp_layer_forward(x, packed, num_blocks=1, add_identity=True)
    out = jax.block_until_ready(out)

    ref = csp_layer_ref(x, params, num_blocks=1, add_identity=True)
    assert out.shape == (N, C, H, W)
    assert jnp.allclose(out, ref, rtol=2e-2, atol=2e-2), (
        "max abs diff = %f" % float(jnp.max(jnp.abs(out - ref))))

    print("KERNEL_OK")
</pallas_src>

<mosaic_0001>
module attributes {stable_mosaic.version = 11 : i64} {
  func.func @_csp_fused_kernel(%arg0: i32, %arg1: memref<1x16x64xbf16, #tpu.memory_space<vmem>>, %arg2: memref<16x16xbf16, #tpu.memory_space<vmem>>, %arg3: memref<16x16xbf16, #tpu.memory_space<vmem>>, %arg4: memref<64x32xbf16, #tpu.memory_space<vmem>>, %arg5: memref<1x32xf32, #tpu.memory_space<vmem>>, %arg6: memref<64x32xbf16, #tpu.memory_space<vmem>>, %arg7: memref<1x32xf32, #tpu.memory_space<vmem>>, %arg8: memref<1x32x32xbf16, #tpu.memory_space<vmem>>, %arg9: memref<1x1x32xf32, #tpu.memory_space<vmem>>, %arg10: memref<3x32x32xbf16, #tpu.memory_space<vmem>>, %arg11: memref<1x1x32xf32, #tpu.memory_space<vmem>>, %arg12: memref<32x64xbf16, #tpu.memory_space<vmem>>, %arg13: memref<32x64xbf16, #tpu.memory_space<vmem>>, %arg14: memref<1x64xf32, #tpu.memory_space<vmem>>, %arg15: memref<1x16x64xf32, #tpu.memory_space<vmem>>) attributes {dimension_semantics = [#tpu.dimension_semantics<parallel>], iteration_bounds = array<i64: 2>, scalar_prefetch = 0 : i64, scratch_operands = 0 : i64, tpu.core_type = #tpu.core_type<tc>, window_params = [{transform_indices = @transform_0, window_bounds = array<i64: 1, 16, 64>}, {pipeline_mode = #tpu.pipeline_mode<synchronous>, transform_indices = @transform_1, window_bounds = array<i64: 16, 16>}, {pipeline_mode = #tpu.pipeline_mode<synchronous>, transform_indices = @transform_2, window_bounds = array<i64: 16, 16>}, {pipeline_mode = #tpu.pipeline_mode<synchronous>, transform_indices = @transform_3, window_bounds = array<i64: 64, 32>}, {pipeline_mode = #tpu.pipeline_mode<synchronous>, transform_indices = @transform_4, window_bounds = array<i64: 1, 32>}, {pipeline_mode = #tpu.pipeline_mode<synchronous>, transform_indices = @transform_5, window_bounds = array<i64: 64, 32>}, {pipeline_mode = #tpu.pipeline_mode<synchronous>, transform_indices = @transform_6, window_bounds = array<i64: 1, 32>}, {pipeline_mode = #tpu.pipeline_mode<synchronous>, transform_indices = @transform_7, window_bounds = array<i64: 1, 32, 32>}, {pipeline_mode = #tpu.pipeline_mode<synchronous>, transform_indices = @transform_8, window_bounds = array<i64: 1, 1, 32>}, {pipeline_mode = #tpu.pipeline_mode<synchronous>, transform_indices = @transform_9, window_bounds = array<i64: 3, 32, 32>}, {pipeline_mode = #tpu.pipeline_mode<synchronous>, transform_indices = @transform_10, window_bounds = array<i64: 1, 1, 32>}, {pipeline_mode = #tpu.pipeline_mode<synchronous>, transform_indices = @transform_11, window_bounds = array<i64: 32, 64>}, {pipeline_mode = #tpu.pipeline_mode<synchronous>, transform_indices = @transform_12, window_bounds = array<i64: 32, 64>}, {pipeline_mode = #tpu.pipeline_mode<synchronous>, transform_indices = @transform_13, window_bounds = array<i64: 1, 64>}, {transform_indices = @transform_14, window_bounds = array<i64: 1, 16, 64>}]} {
    %c0 = arith.constant 0 : index
    %c0_0 = arith.constant 0 : index
    %c0_1 = arith.constant 0 : index
    %0 = vector.load %arg1[%c0, %c0_0, %c0_1] : memref<1x16x64xbf16, #tpu.memory_space<vmem>>, vector<1x16x64xbf16>
    %1 = vector.shape_cast %0 : vector<1x16x64xbf16> to vector<16x64xbf16>
    %c0_2 = arith.constant 0 : index
    %c0_3 = arith.constant 0 : index
    %2 = vector.load %arg2[%c0_2, %c0_3] : memref<16x16xbf16, #tpu.memory_space<vmem>>, vector<16x16xbf16>
    %c0_4 = arith.constant 0 : index
    %c0_5 = arith.constant 0 : index
    %3 = vector.load %arg3[%c0_4, %c0_5] : memref<16x16xbf16, #tpu.memory_space<vmem>>, vector<16x16xbf16>
    %c0_6 = arith.constant 0 : index
    %c0_7 = arith.constant 0 : index
    %4 = vector.load %arg4[%c0_6, %c0_7] : memref<64x32xbf16, #tpu.memory_space<vmem>>, vector<64x32xbf16>
    %c0_8 = arith.constant 0 : index
    %c0_9 = arith.constant 0 : index
    %5 = vector.load %arg5[%c0_8, %c0_9] : memref<1x32xf32, #tpu.memory_space<vmem>>, vector<1x32xf32>
    %cst = arith.constant dense<0.000000e+00> : vector<16x32xf32>
    %6 = tpu.matmul %1, %4, %cst {dimension_numbers = #tpu.dot_dimension_numbers<[1], [0], [0], [1], [0, 0, 1, 1], [], []>} : vector<16x64xbf16>, vector<64x32xbf16>, vector<16x32xf32> -> vector<16x32xf32>
    %7 = vector.broadcast %5 : vector<1x32xf32> to vector<16x32xf32>
    %8 = arith.addf %6, %7 : vector<16x32xf32>
    %9 = arith.negf %8 : vector<16x32xf32>
    %10 = math.exp %9 : vector<16x32xf32>
    %cst_10 = arith.constant 1.000000e+00 : f32
    %11 = vector.broadcast %cst_10 : f32 to vector<16x32xf32>
    %12 = arith.addf %11, %10 : vector<16x32xf32>
    %13 = arith.divf %11, %12 : vector<16x32xf32>
    %14 = arith.mulf %8, %13 : vector<16x32xf32>
    %c0_11 = arith.constant 0 : index
    %c0_12 = arith.constant 0 : index
    %15 = vector.load %arg6[%c0_11, %c0_12] : memref<64x32xbf16, #tpu.memory_space<vmem>>, vector<64x32xbf16>
    %c0_13 = arith.constant 0 : index
    %c0_14 = arith.constant 0 : index
    %16 = vector.load %arg7[%c0_13, %c0_14] : memref<1x32xf32, #tpu.memory_space<vmem>>, vector<1x32xf32>
    %cst_15 = arith.constant dense<0.000000e+00> : vector<16x32xf32>
    %17 = tpu.matmul %1, %15, %cst_15 {dimension_numbers = #tpu.dot_dimension_numbers<[1], [0], [0], [1], [0, 0, 1, 1], [], []>} : vector<16x64xbf16>, vector<64x32xbf16>, vector<16x32xf32> -> vector<16x32xf32>
    %18 = vector.broadcast %16 : vector<1x32xf32> to vector<16x32xf32>
    %19 = arith.addf %17, %18 : vector<16x32xf32>
    %20 = arith.negf %19 : vector<16x32xf32>
    %21 = math.exp %20 : vector<16x32xf32>
    %cst_16 = arith.constant 1.000000e+00 : f32
    %22 = vector.broadcast %cst_16 : f32 to vector<16x32xf32>
    %23 = arith.addf %22, %21 : vector<16x32xf32>
    %24 = arith.divf %22, %23 : vector<16x32xf32>
    %25 = arith.mulf %19, %24 : vector<16x32xf32>
    %26 = arith.truncf %14 : vector<16x32xf32> to vector<16x32xbf16>
    %c0_17 = arith.constant 0 : index
    %c0_18 = arith.constant 0 : index
    %c0_19 = arith.constant 0 : index
    %27 = vector.load %arg8[%c0_17, %c0_18, %c0_19] : memref<1x32x32xbf16, #tpu.memory_space<vmem>>, vector<1x32x32xbf16>
    %28 = vector.shape_cast %27 : vector<1x32x32xbf16> to vector<32x32xbf16>
    %c0_20 = arith.constant 0 : index
    %c0_21 = arith.constant 0 : index
    %c0_22 = arith.constant 0 : index
    %29 = vector.load %arg9[%c0_20, %c0_21, %c0_22] : memref<1x1x32xf32, #tpu.memory_space<vmem>>, vector<1x1x32xf32>
    %30 = vector.shape_cast %29 : vector<1x1x32xf32> to vector<1x32xf32>
    %cst_23 = arith.constant dense<0.000000e+00> : vector<16x32xf32>
    %31 = tpu.matmul %26, %28, %cst_23 {dimension_numbers = #tpu.dot_dimension_numbers<[1], [0], [0], [1], [0, 0, 1, 1], [], []>} : vector<16x32xbf16>, vector<32x32xbf16>, vector<16x32xf32> -> vector<16x32xf32>
    %32 = vector.broadcast %30 : vector<1x32xf32> to vector<16x32xf32>
    %33 = arith.addf %31, %32 : vector<16x32xf32>
    %34 = arith.negf %33 : vector<16x32xf32>
    %35 = math.exp %34 : vector<16x32xf32>
    %cst_24 = arith.constant 1.000000e+00 : f32
    %36 = vector.broadcast %cst_24 : f32 to vector<16x32xf32>
    %37 = arith.addf %36, %35 : vector<16x32xf32>
    %38 = arith.divf %36, %37 : vector<16x32xf32>
    %39 = arith.mulf %33, %38 : vector<16x32xf32>
    %40 = arith.truncf %39 : vector<16x32xf32> to vector<16x32xbf16>
    %cst_25 = arith.constant dense<0.000000e+00> : vector<16x32xf32>
    %41 = tpu.matmul %2, %40, %cst_25 {dimension_numbers = #tpu.dot_dimension_numbers<[1], [0], [0], [1], [0, 0, 1, 1], [], []>} : vector<16x16xbf16>, vector<16x32xbf16>, vector<16x32xf32> -> vector<16x32xf32>
    %42 = arith.truncf %41 : vector<16x32xf32> to vector<16x32xbf16>
    %cst_26 = arith.constant dense<0.000000e+00> : vector<16x32xf32>
    %43 = tpu.matmul %3, %40, %cst_26 {dimension_numbers = #tpu.dot_dimension_numbers<[1], [0], [0], [1], [0, 0, 1, 1], [], []>} : vector<16x16xbf16>, vector<16x32xbf16>, vector<16x32xf32> -> vector<16x32xf32>
    %44 = arith.truncf %43 : vector<16x32xf32> to vector<16x32xbf16>
    %c0_27 = arith.constant 0 : index
    %c0_28 = arith.constant 0 : index
    %c0_29 = arith.constant 0 : index
    %45 = vector.load %arg10[%c0_27, %c0_28, %c0_29] : memref<3x32x32xbf16, #tpu.memory_space<vmem>>, vector<1x32x32xbf16>
    %46 = vector.shape_cast %45 : vector<1x32x32xbf16> to vector<32x32xbf16>
    %cst_30 = arith.constant dense<0.000000e+00> : vector<16x32xf32>
    %47 = tpu.matmul %42, %46, %cst_30 {dimension_numbers = #tpu.dot_dimension_numbers<[1], [0], [0], [1], [0, 0, 1, 1], [], []>} : vector<16x32xbf16>, vector<32x32xbf16>, vector<16x32xf32> -> vector<16x32xf32>
    %c1 = arith.constant 1 : index
    %c0_31 = arith.constant 0 : index
    %c0_32 = arith.constant 0 : index
    %48 = vector.load %arg10[%c1, %c0_31, %c0_32] : memref<3x32x32xbf16, #tpu.memory_space<vmem>>, vector<1x32x32xbf16>
    %49 = vector.shape_cast %48 : vector<1x32x32xbf16> to vector<32x32xbf16>
    %cst_33 = arith.constant dense<0.000000e+00> : vector<16x32xf32>
    %50 = tpu.matmul %40, %49, %cst_33 {dimension_numbers = #tpu.dot_dimension_numbers<[1], [0], [0], [1], [0, 0, 1, 1], [], []>} : vector<16x32xbf16>, vector<32x32xbf16>, vector<16x32xf32> -> vector<16x32xf32>
    %51 = arith.addf %47, %50 : vector<16x32xf32>
    %c2 = arith.constant 2 : index
    %c0_34 = arith.constant 0 : index
    %c0_35 = arith.constant 0 : index
    %52 = vector.load %arg10[%c2, %c0_34, %c0_35] : memref<3x32x32xbf16, #tpu.memory_space<vmem>>, vector<1x32x32xbf16>
    %53 = vector.shape_cast %52 : vector<1x32x32xbf16> to vector<32x32xbf16>
    %cst_36 = arith.constant dense<0.000000e+00> : vector<16x32xf32>
    %54 = tpu.matmul %44, %53, %cst_36 {dimension_numbers = #tpu.dot_dimension_numbers<[1], [0], [0], [1], [0, 0, 1, 1], [], []>} : vector<16x32xbf16>, vector<32x32xbf16>, vector<16x32xf32> -> vector<16x32xf32>
    %55 = arith.addf %51, %54 : vector<16x32xf32>
    %c0_37 = arith.constant 0 : index
    %c0_38 = arith.constant 0 : index
    %c0_39 = arith.constant 0 : index
    %56 = vector.load %arg11[%c0_37, %c0_38, %c0_39] : memref<1x1x32xf32, #tpu.memory_space<vmem>>, vector<1x1x32xf32>
    %57 = vector.shape_cast %56 : vector<1x1x32xf32> to vector<1x32xf32>
    %58 = vector.broadcast %57 : vector<1x32xf32> to vector<16x32xf32>
    %59 = arith.addf %55, %58 : vector<16x32xf32>
    %60 = arith.negf %59 : vector<16x32xf32>
    %61 = math.exp %60 : vector<16x32xf32>
    %cst_40 = arith.constant 1.000000e+00 : f32
    %62 = vector.broadcast %cst_40 : f32 to vector<16x32xf32>
    %63 = arith.addf %62, %61 : vector<16x32xf32>
    %64 = arith.divf %62, %63 : vector<16x32xf32>
    %65 = arith.mulf %59, %64 : vector<16x32xf32>
    %66 = arith.addf %65, %14 : vector<16x32xf32>
    %67 = arith.truncf %66 : vector<16x32xf32> to vector<16x32xbf16>
    %c0_41 = arith.constant 0 : index
    %c0_42 = arith.constant 0 : index
    %68 = vector.load %arg12[%c0_41, %c0_42] : memref<32x64xbf16, #tpu.memory_space<vmem>>, vector<32x64xbf16>
    %cst_43 = arith.constant dense<0.000000e+00> : vector<16x64xf32>
    %69 = tpu.matmul %67, %68, %cst_43 {dimension_numbers = #tpu.dot_dimension_numbers<[1], [0], [0], [1], [0, 0, 1, 1], [], []>} : vector<16x32xbf16>, vector<32x64xbf16>, vector<16x64xf32> -> vector<16x64xf32>
    %70 = arith.truncf %25 : vector<16x32xf32> to vector<16x32xbf16>
    %c0_44 = arith.constant 0 : index
    %c0_45 = arith.constant 0 : index
    %71 = vector.load %arg13[%c0_44, %c0_45] : memref<32x64xbf16, #tpu.memory_space<vmem>>, vector<32x64xbf16>
    %cst_46 = arith.constant dense<0.000000e+00> : vector<16x64xf32>
    %72 = tpu.matmul %70, %71, %cst_46 {dimension_numbers = #tpu.dot_dimension_numbers<[1], [0], [0], [1], [0, 0, 1, 1], [], []>} : vector<16x32xbf16>, vector<32x64xbf16>, vector<16x64xf32> -> vector<16x64xf32>
    %73 = arith.addf %69, %72 : vector<16x64xf32>
    %c0_47 = arith.constant 0 : index
    %c0_48 = arith.constant 0 : index
    %74 = vector.load %arg14[%c0_47, %c0_48] : memref<1x64xf32, #tpu.memory_space<vmem>>, vector<1x64xf32>
    %75 = vector.broadcast %74 : vector<1x64xf32> to vector<16x64xf32>
    %76 = arith.addf %73, %75 : vector<16x64xf32>
    %77 = arith.negf %76 : vector<16x64xf32>
    %78 = math.exp %77 : vector<16x64xf32>
    %cst_49 = arith.constant 1.000000e+00 : f32
    %79 = vector.broadcast %cst_49 : f32 to vector<16x64xf32>
    %80 = arith.addf %79, %78 : vector<16x64xf32>
    %81 = arith.divf %79, %80 : vector<16x64xf32>
    %82 = arith.mulf %76, %81 : vector<16x64xf32>
    %c0_50 = arith.constant 0 : index
    %c0_51 = arith.constant 0 : index
    %c0_52 = arith.constant 0 : index
    %83 = vector.load %arg15[%c0_50, %c0_51, %c0_52] : memref<1x16x64xf32, #tpu.memory_space<vmem>>, vector<1x16x64xf32>
    %84 = vector.shape_cast %83 : vector<1x16x64xf32> to vector<16x64xf32>
    %85 = vector.shape_cast %82 : vector<16x64xf32> to vector<1x16x64xf32>
    tpu.vector_store %arg15[%c0_50, %c0_51, %c0_52], %85 {strides = array<i32>} : memref<1x16x64xf32, #tpu.memory_space<vmem>>, vector<1x16x64xf32>,
    return
  }
  func.func @transform_0(%arg0: i32) -> (i32, i32, i32) {
    %c0_i32 = arith.constant 0 : i32
    %c0_i32_0 = arith.constant 0 : i32
    %c0_i32_1 = arith.constant 0 : i32
    return %arg0, %c0_i32, %c0_i32_0 : i32, i32, i32
  }
  func.func @transform_1(%arg0: i32) -> (i32, i32) {
    %c0_i32 = arith.constant 0 : i32
    %c0_i32_0 = arith.constant 0 : i32
    %c0_i32_1 = arith.constant 0 : i32
    return %c0_i32, %c0_i32_0 : i32, i32
  }
  func.func @transform_2(%arg0: i32) -> (i32, i32) {
    %c0_i32 = arith.constant 0 : i32
    %c0_i32_0 = arith.constant 0 : i32
    %c0_i32_1 = arith.constant 0 : i32
    return %c0_i32, %c0_i32_0 : i32, i32
  }
  func.func @transform_3(%arg0: i32) -> (i32, i32) {
    %c0_i32 = arith.constant 0 : i32
    %c0_i32_0 = arith.constant 0 : i32
    %c0_i32_1 = arith.constant 0 : i32
    return %c0_i32, %c0_i32_0 : i32, i32
  }
  func.func @transform_4(%arg0: i32) -> (i32, i32) {
    %c0_i32 = arith.constant 0 : i32
    %c0_i32_0 = arith.constant 0 : i32
    %c0_i32_1 = arith.constant 0 : i32
    return %c0_i32, %c0_i32_0 : i32, i32
  }
  func.func @transform_5(%arg0: i32) -> (i32, i32) {
    %c0_i32 = arith.constant 0 : i32
    %c0_i32_0 = arith.constant 0 : i32
    %c0_i32_1 = arith.constant 0 : i32
    return %c0_i32, %c0_i32_0 : i32, i32
  }
  func.func @transform_6(%arg0: i32) -> (i32, i32) {
    %c0_i32 = arith.constant 0 : i32
    %c0_i32_0 = arith.constant 0 : i32
    %c0_i32_1 = arith.constant 0 : i32
    return %c0_i32, %c0_i32_0 : i32, i32
  }
  func.func @transform_7(%arg0: i32) -> (i32, i32, i32) {
    %c0_i32 = arith.constant 0 : i32
    %c0_i32_0 = arith.constant 0 : i32
    %c0_i32_1 = arith.constant 0 : i32
    %c0_i32_2 = arith.constant 0 : i32
    return %c0_i32, %c0_i32_0, %c0_i32_1 : i32, i32, i32
  }
  func.func @transform_8(%arg0: i32) -> (i32, i32, i32) {
    %c0_i32 = arith.constant 0 : i32
    %c0_i32_0 = arith.constant 0 : i32
    %c0_i32_1 = arith.constant 0 : i32
    %c0_i32_2 = arith.constant 0 : i32
    return %c0_i32, %c0_i32_0, %c0_i32_1 : i32, i32, i32
  }
  func.func @transform_9(%arg0: i32) -> (i32, i32, i32) {
    %c0_i32 = arith.constant 0 : i32
    %c0_i32_0 = arith.constant 0 : i32
    %c0_i32_1 = arith.constant 0 : i32
    %c0_i32_2 = arith.constant 0 : i32
    return %c0_i32, %c0_i32_0, %c0_i32_1 : i32, i32, i32
  }
  func.func @transform_10(%arg0: i32) -> (i32, i32, i32) {
    %c0_i32 = arith.constant 0 : i32
    %c0_i32_0 = arith.constant 0 : i32
    %c0_i32_1 = arith.constant 0 : i32
    %c0_i32_2 = arith.constant 0 : i32
    return %c0_i32, %c0_i32_0, %c0_i32_1 : i32, i32, i32
  }
  func.func @transform_11(%arg0: i32) -> (i32, i32) {
    %c0_i32 = arith.constant 0 : i32
    %c0_i32_0 = arith.constant 0 : i32
    %c0_i32_1 = arith.constant 0 : i32
    return %c0_i32, %c0_i32_0 : i32, i32
  }
  func.func @transform_12(%arg0: i32) -> (i32, i32) {
    %c0_i32 = arith.constant 0 : i32
    %c0_i32_0 = arith.constant 0 : i32
    %c0_i32_1 = arith.constant 0 : i32
    return %c0_i32, %c0_i32_0 : i32, i32
  }
  func.func @transform_13(%arg0: i32) -> (i32, i32) {
    %c0_i32 = arith.constant 0 : i32
    %c0_i32_0 = arith.constant 0 : i32
    %c0_i32_1 = arith.constant 0 : i32
    return %c0_i32, %c0_i32_0 : i32, i32
  }
  func.func @transform_14(%arg0: i32) -> (i32, i32, i32) {
    %c0_i32 = arith.constant 0 : i32
    %c0_i32_0 = arith.constant 0 : i32
    %c0_i32_1 = arith.constant 0 : i32
    return %arg0, %c0_i32, %c0_i32_0 : i32, i32, i32
  }
}

</mosaic_0001>

<bundles_post_ra>
// kernel: tpu_custom_call.1
= control target key start
LH: loop header
LB: loop body
LE: loop exit
PB: predicated region body
PF: predicated region fallthrough
CT: control target
= control target key end

     0   :  { %s2180_s0 = inlined_call_operand.vmem [shape: bf16[2,16,64], index: 0, kind: input, shape index: {}]   ;;  %s2181_s1 = inlined_call_operand.hbm [shape: bf16[16,16], index: 1, kind: input, shape index: {}]   ;;  %s2182_s2 = inlined_call_operand.hbm [shape: bf16[16,16], index: 2, kind: input, shape index: {}]   ;;  %s2183_s3 = inlined_call_operand.vmem [shape: bf16[64,32], index: 3, kind: input, shape index: {}]   ;;  %s2184_s4 = inlined_call_operand.vmem [shape: f32[1,32], index: 4, kind: input, shape index: {}]   ;;  %s2185_s5 = inlined_call_operand.vmem [shape: bf16[64,32], index: 5, kind: input, shape index: {}]   ;;  %s2186_s6 = inlined_call_operand.vmem [shape: f32[1,32], index: 6, kind: input, shape index: {}]   ;;  %s2187_s7 = inlined_call_operand.vmem [shape: bf16[1,32,32], index: 7, kind: input, shape index: {}]   ;;  %s2188_s8 = inlined_call_operand.vmem [shape: f32[1,1,32], index: 8, kind: input, shape index: {}]   ;;  %s2189_s9 = inlined_call_operand.vmem [shape: bf16[3,32,32], index: 9, kind: input, shape index: {}]   ;;  %s2190_s10 = inlined_call_operand.vmem [shape: f32[1,1,32], index: 10, kind: input, shape index: {}]   ;;  %s2191_s11 = inlined_call_operand.vmem [shape: bf16[32,64], index: 11, kind: input, shape index: {}]   ;;  %s2192_s12 = inlined_call_operand.vmem [shape: bf16[32,64], index: 12, kind: input, shape index: {}]   ;;  %s2193_s13 = inlined_call_operand.vmem [shape: f32[1,64], index: 13, kind: input, shape index: {}]   ;;  %s2194_s14 = inlined_call_operand.hbm [shape: f32[2,16,64], index: 14, kind: output, shape index: {}]  }
   0x1   :  { %2207 = sst [smem:[#allocation18_spill]] %s2194_s14 }
   0x2   :  { %19 = vsyncpa [#allocation3], 0 }
   0x3   :  { %20 = vsyncpa [#allocation6], 0 }
   0x4   :  { %21 = vsyncpa [#allocation4], 0 }
   0x5   :  { %23 = vsyncpa [#allocation4 + $0x1], 0  ;;  %s1870_s29 = smov 0   ;;  %s1872_s30 = smov 0  }
   0x6   :  { %s1874_s15 = smov 0   ;;  %s1876_s16 = smov 0  }
   0x7 LB: > { %2208 = sst [smem:[#allocation11_spill]] %s1772_s29  ;;  %s1891_s17 = sadd.s32 4294967295, %s1784_s16   ;;  %s1784_s16 = sphi %s1876_s16, %s2231_s16   ;;  %s1780_s15 = sphi %s1874_s15, %s2233_s15   ;;  %s1776_s30 = sphi %s1872_s30, %s2235_s30   ;;  %s1772_s29 = sphi %s1870_s29, %s2234_s29  }
   0x8   : > { %2209 = sst [smem:[#allocation12_spill]] %s1780_s15  ;;  %s1339_s18 = sadd.s32 4294967294, %s1784_s16  }
   0x9   : > { %2210 = sst [smem:[#allocation13_spill]] %s1784_s16  ;;  %s1895_s19 = sadd.s32 1, %s1784_s16  }
   0xa   : > { %2211 = sst [smem:[#allocation14_spill]] %s1895_s19  ;;  %s335_s20 = sadd.s32 1, %s1780_s15 }
   0xb   : > { %s332_s21 = ssub.s32 %s1784_s16, %s1895_s19  ;;  %p345_p0 = scmp.ne.s32.totalorder %s1780_s15, %s1776_s30 }
   0xc   : > { %p333_p1 = scmp.eq.s32.totalorder %s332_s21, 0  ;;  %p346_p2 = scmp.eq.s32.totalorder %s1891_s17, 1 }
   0xd   : > { %p351_p3 = scmp.ne.s32.totalorder %s1776_s30, %s1772_s29  ;;  %p352_p4 = scmp.eq.s32.totalorder %s1339_s18, 1 }
   0xe   : > { %s1906_s22 = scalar_select %p333_p1, %s1780_s15, %s335_s20  }
   0xf   : > { %p1908_p5 = por %p346_p2, %p345_p0  ;;  %p1912_p6 = por %p352_p4, %p351_p3 }
  0x10   : > { %2212 = sst [smem:[#allocation15_spill]] %s1906_s22  ;;  %p1340_p7 = scmp.ge.s32.totalorder %s1784_s16, 1 }
  0x11   : > { %s2213_s23 = scalar_select %p1908_p5, 1, 0 }
  0x12   : > { %s2215_s24 = scalar_select %p1912_p6, 1, 0 }
  0x13   : > { %2214 = sst [smem:[#allocation16_spill]] %s2213_s23  ;;  %p359_p8 = scmp.lt.s32.totalorder %s1784_s16, 3 }
  0x14   : > { %2216 = sst [smem:[#allocation17_spill]] %s2215_s24  ;;  %p2200_p9 = scmp.eq.s32.totalorder %s1891_s17, 0 }
  0x15   : > { %p1919_p10 = pnand %p1340_p7, %p359_p8  ;;  %s1786_s26 = smov [#allocation2]  }
  0x16   : > { %s371_s27 = sshll.u32 %s1786_s26, 4  ;;  %s1787_s18 = smov [#allocation5]   ;;  %s372_s27 = int_to_ptr.vmem [resolvable:$true] %s371_s27 }
  0x17   : > { %s2217_s25 = scalar_select %p1919_p10, 1, 0 }
  0x18   : > { %p1539_p11 = pneg %p1919_p10  ;;  %s384_s20 = sshll.u32 %s1787_s18, 4  ;;  %s1931_s20 = int_to_ptr.vmem [resolvable:$true] %s384_s20 }
  0x19   : > { %s1658_s15 = scalar_lea.hbm %s2181_s1, 128 }
  0x1a   : > { %p1927_p12 = pnand %p2200_p9, %p1539_p11  ;;  %p1659_p13 = scmp.ne.s32.totalorder %s2181_s1, %s1658_s15 }
  0x1b   : > { %p1665_p3 = scmp.lt.u32.totalorder %s1658_s15, %s2181_s1 }
  0x1c   : > { %p1660_p0 = pneg %p1927_p12 }
  0x1e   : > { %p1661_p1 = pnand %p1660_p0, %p1659_p13 }
  0x20   : > { %p1662_p2 = pneg %p1661_p1 }
  0x22   : > { %p1667_p4 = pnand %p1665_p3, %p1662_p2 }
  0x24   : > { %1670 = shalt.err (!%p1667_p4)
}
  0x25   : > { %s1671_s18 = scalar_lea.vmem %s372_s27, 128  ;;  %p1679_p9 = scmp.lt.s32.totalorder %s372_s27, %s372_s27 }
  0x26   : > { %p1672_p7 = scmp.ne.s32.totalorder %s372_s27, %s1671_s18  ;;  %p1680_p6 = scmp.lt.s32.totalorder %s1671_s18, %s1671_s18 }
  0x28   : > { %p1674_p8 = pnand %p1672_p7, %p1660_p0  ;;  %p1681_p5 = por %p1680_p6, %p1679_p9 }
  0x2a   : > { %p1675_p11 = pneg %p1674_p8 }
  0x2c   : > { %p1682_p10 = pnand %p1681_p5, %p1675_p11 }
  0x2e   : > { %1685 = shalt.err (!%p1682_p10)
}
  0x2f   : > { %s1788_s19 = smov 64   ;;  %s1789_s22 = smov 4  }
  0x30   : > { %1542 = dma.hbm_to_vmem [thread:$0]  (!%p1927_p12), %s2181_s1, 128, %s372_s27, [#allocation3], %s1788_s19, %s1788_s19, %s1789_s22  }
  0x31   : > { %s1686_s26 = scalar_lea.hbm %s2182_s2, 128 }
  0x32   : > { %p1687_p13 = scmp.ne.s32.totalorder %s2182_s2, %s1686_s26  ;;  %p1693_p9 = scmp.lt.u32.totalorder %s1686_s26, %s2182_s2 }
  0x34   : > { %p1689_p5 = pnand %p1687_p13, %p1660_p0 }
  0x36   : > { %p1690_p6 = pneg %p1689_p5 }
  0x38   : > { %p1695_p10 = pnand %p1693_p9, %p1690_p6 }
  0x3a   : > { %1698 = shalt.err (!%p1695_p10)
}
  0x3b   : > { %s1699_s27 = scalar_lea.vmem %s1931_s20, 128  ;;  %p1707_p4 = scmp.lt.s32.totalorder %s1931_s20, %s1931_s20 }
  0x3c   : > { %p1700_p1 = scmp.ne.s32.totalorder %s1931_s20, %s1699_s27  ;;  %p1708_p7 = scmp.lt.s32.totalorder %s1699_s27, %s1699_s27 }
  0x3e   : > { %p1702_p2 = pnand %p1700_p1, %p1660_p0  ;;  %p1709_p8 = por %p1708_p7, %p1707_p4 }
  0x40   : > { %p1703_p3 = pneg %p1702_p2 }
  0x42   : > { %p1710_p11 = pnand %p1709_p8, %p1703_p3 }
  0x44   : > { %1713 = shalt.err (!%p1710_p11)
}
  0x45   : > { %1545 = dma.hbm_to_vmem [thread:$0]  (!%p1927_p12), %s2182_s2, 128, %s1931_s20, [#allocation6], %s1788_s19, %s1788_s19, %s1789_s22  }
  0x46   : > { %p2219_p13 = scmp.ne.s32.totalorder %s2217_s25, 0 }
  0x47   : > { %p2220_p5 = scmp.eq.s32.totalorder (!%p2219_p13), %s1891_s17, 0 }
  0x48   : > { %441 = sbr.rel (%p2219_p13) target bundleno = 1326 (0x52e), region = 76 }
  0x4f   : > { %1759 = dma.done.wait (%p2220_p5), [#allocation3], 128   ;;  %p2221_p0 = pmov %p2220_p5 }
  0x51   : > { %1761 = vsyncadd (%p2221_p0), [#allocation3], 4294967168  ;;  %p2222_p6 = pmov %p2221_p0 }
  0x52   : > { %p2223_p9 = pmov %p2221_p0 }
  0x53   : > { %1763 = dma.done.wait (%p2222_p6), [#allocation6], 128  }
  0x54   : > { %1765 = vsyncadd (%p2223_p9), [#allocation6], 4294967168  ;;  %p491_p10 = scmp.lt.s32.totalorder %s1891_s17, 1  ;;  %v1790_v0 = vmov 0.0   ;;  %vm1791_vm0 = vmmov 0   ;;  %v1595_v1 = vld [vmem:[%s2183_s3] sm:$0xff]  }
  0x55   : > { %1445 = vmatprep.subr.bf16.mxu0 %v1790_v0  ;;  %1453 = vmatprep.mubr.msk.bf16.mxu0 %vm1791_vm0, %v1790_v0  ;;  %v1596_v2 = vld [vmem:[%s2183_s3 + $0x8] sm:$0xff]   ;;  %v1597_v3 = vld [vmem:[%s2183_s3 + $0x10] sm:$0xff]   ;;  %vm547_vm1 = vcmask 523264   ;;  %v1598_v4 = vld [vmem:[%s2183_s3 + $0x18] sm:$0xff]   ;;  %vm724_vm2 = vcmask 261120   ;;  %vm789_vm3 = vcmask 130048  }
  0x56   : > { %1457 = vmatprep.subr.bf16.mxu1 %v1790_v0  ;;  %1465 = vmatprep.mubr.msk.bf16.mxu1 %vm1791_vm0, %v1790_v0  ;;  %s492_s23 = scalar_select %p491_p10, %s1891_s17, 1  ;;  %v1600_v6 = vld [vmem:[%s2187_s7] sm:$0xff]   ;;  %v1601_v7 = vld [vmem:[%s2187_s7 + $0x8] sm:$0xff]   ;;  %v1604_v10 = vld [vmem:[%s2185_s5 + $0x10] sm:$0xff]  }
  0x57   : > { %1446 = vmatpush3.bf16.msra.mxu0 %v1595_v1  ;;  %v1602_v8 = vld [vmem:[%s2185_s5] sm:$0xff]   ;;  %v1603_v9 = vld [vmem:[%s2185_s5 + $0x8] sm:$0xff]   ;;  %v1605_v29 = vld [vmem:[%s2185_s5 + $0x18] sm:$0xff]   ;;  %s488_s26 = sand.u32 1, %s1776_s30   ;;  %s2224_s18 = sld [smem:[#allocation16_spill]] }
  0x58   : > { %s1411_s20 = sshll.u32 %s492_s23, 3  ;;  %1447 = vmatprep.subr.bf16.mxu0 %v1790_v0  ;;  %1458 = vmatpush3.bf16.msra.mxu1 %v1602_v8  ;;  %v1350_v11 = vld [vmem:[%s2184_s4] ss:$0 sm:$0xff]  ;;  %v1608_v49 = vld [vmem:[#allocation5] sm:$0xff]   ;;  %v1607_v50 = vld [vmem:[%s2189_s9 + $0x10] sm:$0xff]   ;;  %s1347_s27 = sshll.u32 %s488_s26, 4 }
  0x59   : > { %s495_s24 = scalar_lea.vmem %s2180_s0, %s1411_s20  ;;  %1459 = vmatprep.subr.bf16.mxu1 %v1790_v0  ;;  %v1367_v30 = vld [vmem:[%s2188_s8] ss:$0 sm:$0xff]  ;;  %v1609_v52 = vld [vmem:[%s2189_s9 + $0x18] sm:$0xff]   ;;  %s1412_s14 = sshll.u32 %s1891_s17, 8 }
  0x5a   : > { %v1599_v5 = vld [vmem:[%s495_s24] sm:$0xff]   ;;  %s490_s16 = scalar_lea.vmem [#allocation7], %s1347_s27  ;;  %s2225_s20 = sld [smem:[#allocation18_spill]] }
  0x5b   : > { %1448 = vmatpush3.bf16.msra.mxu0 %v1596_v2  ;;  %v1606_v48 = vld [vmem:[#allocation2] sm:$0xff]   ;;  %s1255_s23 = sshll.u32 %s490_s16, 4  ;;  %s2139_s17 = scalar_lea.sflag [#allocation4], %s488_s26  ;;  %s2135_s23 = int_to_ptr.vmem [resolvable:$true] %s1255_s23 }
  0x5c   : > { %1449 = vmatprep.subr.bf16.mxu0 %v1790_v0  ;;  %1460 = vmatpush3.bf16.msra.mxu1 %v1603_v9  ;;  %v1610_v51 = vld [vmem:[%s2189_s9] sm:$0xff]   ;;  %v1612_v9 = vld [vmem:[%s2189_s9 + $0x8] sm:$0xff]   ;;  %s1714_s22 = scalar_lea.vmem %s2135_s23, 256  ;;  %s1792_s29 = smov [#allocation7]  }
  0x5d   : > { %1461 = vmatprep.subr.bf16.mxu1 %v1790_v0  ;;  %v1359_v53 = vld [vmem:[%s2186_s6] ss:$0 sm:$0xff]  ;;  %p1715_p12 = scmp.ne.s32.totalorder %s2135_s23, %s1714_s22  ;;  %p2226_p1 = scmp.ne.s32.totalorder %s2224_s18, 0 }
  0x5e   : > { %s1718_s15 = sshll.u32 %s1792_s29, 4  ;;  %s1719_s15 = int_to_ptr.vmem [resolvable:$false] %s1718_s15 }
  0x5f   : > { %1450 = vmatpush3.bf16.msra.mxu0 %v1597_v3  ;;  %p1716_p2 = pnand %p1715_p12, %p2226_p1  ;;  %s1720_s24 = scalar_lea.vmem %s1719_s15, 512 }
  0x60   : > { %1451 = vmatprep.subr.bf16.mxu0 %v1790_v0  ;;  %1462 = vmatpush3.bf16.msra.mxu1 %v1604_v10  ;;  %v1613_v10 = vld [vmem:[%s2189_s9 + $0x28] sm:$0xff]   ;;  %s2133_s19 = scalar_lea.hbm %s2225_s20, %s1412_s14  ;;  %p1721_p4 = scmp.lt.s32.totalorder %s2135_s23, %s1719_s15 }
  0x61   : > { %1463 = vmatprep.subr.bf16.mxu1 %v1790_v0  ;;  %p1717_p3 = pneg %p1716_p2  ;;  %p1722_p7 = scmp.lt.s32.totalorder %s1720_s24, %s1714_s22 }
  0x63   : > { %1452 = vmatpush3.bf16.msra.mxu0 %v1598_v4  ;;  %p1723_p8 = por %p1722_p7, %p1721_p4 }
  0x64   : > { %1469 = vmatprep.subr.bf16.mxu0 %v1790_v0  ;;  %1464 = vmatpush3.bf16.msra.mxu1 %v1605_v29  ;;  %v1616_v29 = vld [vmem:[%s2191_s11] sm:$0xff]  }
  0x65   : > { %1477 = vmatprep.subr.bf16.mxu1 %v1790_v0  ;;  %p1724_p11 = pnand %p1723_p8, %p1717_p3 }
  0x66   : > { %1454 = vmatmul.mubr.msk.bf16.vlgmr.msra.gmra.mrb[0].mxu0 %vm547_vm1, %v1599_v5 }
  0x67   : > { %1473 = vmatprep.mubr.msk.bf16.mxu0 %vm1791_vm0, %v1790_v0  ;;  %1470 = vmatpush3.bf16.msra.mxu0 %v1600_v6 }
  0x68   : > { %1471 = vmatprep.subr.bf16.mxu0 %v1790_v0  ;;  %1466 = vmatmul.mubr.msk.bf16.vlgmr.msra.gmra.mrb[0].mxu1 %vm547_vm1, %v1599_v5 }
  0x69   : > { %1479 = vmatprep.mubr.msk.bf16.mxu1 %vm1791_vm0, %v1790_v0 }
  0x6b   : > { %1472 = vmatpush3.bf16.msra.mxu0 %v1601_v7  ;;  %v1611_v7 = vld [vmem:[%s2189_s9 + $0x20] sm:$0xff]  }
  0x6c   : > { %1483 = vmatprep.subr.bf16.mxu0 %v1790_v0 }
 0x139   : > { %v585_v12 = vpop.f32.mrb[0].mxu0 }
 0x13a   : > { %v586_v13 = vadd.f32 %v1350_v11, %v585_v12  ;;  %v1455_v14 = vpop.f32.mrb[1].mxu0 }
 0x13b   : > { %v588_v15 = vpop.f32.mrb[2].mxu0  ;;  %v679_v54 = vpop.f32.mrb[0].mxu1 }
 0x13c   : > { %v1357_v16 = vmul.f32 -1.442695, %v586_v13  ;;  %v589_v17 = vadd.f32 %v1350_v11, %v588_v15  ;;  %v1456_v18 = vpop.f32.mrb[3].mxu0  ;;  %v680_v55 = vadd.f32 %v1359_v53, %v679_v54  ;;  %v1467_v56 = vpop.f32.mrb[1].mxu1 }
 0x13d   : > { %v682_v57 = vpop.f32.mrb[2].mxu1 }
 0x13e   : > { %1618 = vpow2.f32 %v1357_v16  ;;  %v1358_v19 = vmul.f32 -1.442695, %v589_v17  ;;  %v1365_v58 = vmul.f32 -1.442695, %v680_v55  ;;  %v683_v59 = vadd.f32 %v1359_v53, %v682_v57  ;;  %v1468_v60 = vpop.f32.mrb[3].mxu1 }
 0x140   : > { %1620 = vpow2.f32 %v1358_v19  ;;  %v1366_v61 = vmul.f32 -1.442695, %v683_v59 }
 0x148   : > { %v1619_v20 = vpop.eup %1618 }
 0x149   : > { %v598_v21 = vadd.f32 1.0, %v1619_v20 }
 0x14a   : > { %v1621_v22 = vpop.eup %1620 }
 0x14b   : > { %1622 = vrcp.f32 %v598_v21  ;;  %v599_v23 = vadd.f32 1.0, %v1621_v22  ;;  %v1615_v22 = vld [vmem:[%s2192_s12 + $0x8] sm:$0xff]  }
 0x14d   : > { %1624 = vrcp.f32 %v599_v23 }
 0x155   : > { %v1623_v24 = vpop.eup %1622 }
 0x156   : > { %v2043_v26 = vmul.f32 %v1623_v24, %v586_v13 }
 0x157   : > { %v1625_v25 = vpop.eup %1624 }
 0x158   : > { %v2045_v27 = vmul.f32 %v1625_v25, %v589_v17  ;;  %v1614_v17 = vld [vmem:[%s2192_s12] sm:$0xff]  }
 0x15a   : > { %v700_v28 = vpack.c.bf16 %v2045_v27, %v2043_v26 }
 0x15c   : > { %1474 = vmatmul.mubr.msk.bf16.vlgmr.msra.gmra.mrb[4].mxu0 %vm724_vm2, %v700_v28 }
 0x15d   : > { %1485 = vmatprep.mubr.msk.bf16.mxu0 %vm1791_vm0, %v1790_v0 }
 0x22f   : > { %v762_v31 = vpop.f32.mrb[4].mxu0 }
 0x230   : > { %v763_v32 = vadd.f32 %v1367_v30, %v762_v31  ;;  %v1475_v33 = vpop.f32.mrb[5].mxu0 }
 0x231   : > { %v765_v34 = vpop.f32.mrb[6].mxu0 }
 0x232   : > { %v1371_v35 = vmul.f32 -1.442695, %v763_v32  ;;  %v766_v36 = vadd.f32 %v1367_v30, %v765_v34  ;;  %v1476_v37 = vpop.f32.mrb[7].mxu0  ;;  %v1617_v30 = vld [vmem:[%s2191_s11 + $0x8] sm:$0xff]  }
 0x233   : > { %v1394_v37 = vld [vmem:[%s2190_s10] ss:$0 sm:$0xff] }
 0x234   : > { %1626 = vpow2.f32 %v1371_v35  ;;  %v1372_v38 = vmul.f32 -1.442695, %v766_v36 }
 0x236   : > { %1628 = vpow2.f32 %v1372_v38 }
 0x23e   : > { %v1627_v39 = vpop.eup %1626 }
 0x23f   : > { %v775_v40 = vadd.f32 1.0, %v1627_v39 }
 0x240   : > { %v1629_v41 = vpop.eup %1628 }
 0x241   : > { %1630 = vrcp.f32 %v775_v40  ;;  %v776_v42 = vadd.f32 1.0, %v1629_v41 }
 0x243   : > { %1632 = vrcp.f32 %v776_v42 }
 0x244   : > { %1634 = vpow2.f32 %v1365_v58 }
 0x245   : > { %1636 = vpow2.f32 %v1366_v61 }
 0x24b   : > { %v1631_v43 = vpop.eup %1630 }
 0x24c   : > { %v781_v45 = vmul.f32 %v1631_v43, %v763_v32 }
 0x24d   : > { %v1633_v44 = vpop.eup %1632 }
 0x24e   : > { %v782_v46 = vmul.f32 %v1633_v44, %v766_v36  ;;  %v1635_v62 = vpop.eup %1634 }
 0x24f   : > { %v692_v63 = vadd.f32 1.0, %v1635_v62  ;;  %v1637_v1 = vpop.eup %1636 }
 0x250   : > { %v783_v47 = vpack.c.bf16 %v782_v46, %v781_v45  ;;  %v693_v2 = vadd.f32 1.0, %v1637_v1 }
 0x251   : > { %1638 = vrcp.f32 %v692_v63  ;;  %v1403_v63 = vld [vmem:[%s2193_s13] ss:$0 sm:$0xff] }
 0x252   : > { %1478 = vmatpush3.bf16.msra.mxu1 %v783_v47  ;;  %1484 = vmatpush3.bf16.msra.mxu0 %v783_v47  ;;  %1640 = vrcp.f32 %v693_v2 }
 0x253   : > { %1489 = vmatprep.subr.bf16.mxu1 %v1790_v0  ;;  %1497 = vmatprep.subr.bf16.mxu0 %v1790_v0 }
 0x255   : > { %1480 = vmatmul.mubr.msk.bf16.vlgmr.msra.gmra.mrb[4].mxu1 %vm789_vm3, %v1606_v48  ;;  %1486 = vmatmul.mubr.msk.bf16.vlgmr.msra.gmra.mrb[8].mxu0 %vm789_vm3, %v1608_v49 }
 0x256   : > { %1490 = vmatpush3.bf16.msra.mxu1 %v1607_v50  ;;  %1493 = vmatprep.mubr.msk.bf16.mxu1 %vm1791_vm0, %v1790_v0 }
 0x257   : > { %1491 = vmatprep.subr.bf16.mxu1 %v1790_v0  ;;  %1498 = vmatpush3.bf16.msra.mxu0 %v1610_v51 }
 0x258   : > { %1499 = vmatprep.subr.bf16.mxu0 %v1790_v0  ;;  %1501 = vmatprep.mubr.msk.bf16.mxu0 %vm1791_vm0, %v1790_v0 }
 0x25a   : > { %1492 = vmatpush3.bf16.msra.mxu1 %v1609_v52 }
 0x25b   : > { %1505 = vmatprep.subr.bf16.mxu1 %v1790_v0  ;;  %v1639_v3 = vpop.eup %1638  ;;  %1500 = vmatpush3.bf16.msra.mxu0 %v1612_v9 }
 0x25c   : > { %v698_v4 = vmul.f32 %v1639_v3, %v680_v55  ;;  %v1641_v5 = vpop.eup %1640  ;;  %1513 = vmatprep.subr.bf16.mxu0 %v1790_v0 }
 0x25d   : > { %1494 = vmatmul.mubr.msk.bf16.vlgmr.msra.gmra.mrb[8].mxu1 %vm724_vm2, %v783_v47  ;;  %v699_v6 = vmul.f32 %v1641_v5, %v683_v59 }
 0x25e   : > { %1509 = vmatprep.mubr.msk.bf16.mxu1 %vm1791_vm0, %v1790_v0  ;;  %1506 = vmatpush3.bf16.msra.mxu1 %v1611_v7 }
 0x25f   : > { %v1099_v8 = vpack.c.bf16 %v699_v6, %v698_v4  ;;  %1507 = vmatprep.subr.bf16.mxu1 %v1790_v0 }
 0x262   : > { %1508 = vmatpush3.bf16.msra.mxu1 %v1613_v10 }
 0x263   : > { %1521 = vmatprep.subr.bf16.mxu1 %v1790_v0 }
 0x328   : > { %v827_v11 = vpop.f32.mrb[4].mxu1  ;;  %v877_v12 = vpop.f32.mrb[8].mxu0 }
 0x329   : > { %v1481_v13 = vpop.f32.mrb[5].mxu1  ;;  %v1487_v14 = vpop.f32.mrb[9].mxu0 }
 0x32a   : > { %v830_v15 = vpop.f32.mrb[6].mxu1  ;;  %v880_v16 = vpop.f32.mrb[10].mxu0 }
 0x32b   : > { %v834_v18 = vpack.c.bf16 %v830_v15, %v827_v11  ;;  %v884_v19 = vpack.c.bf16 %v880_v16, %v877_v12  ;;  %v1482_v20 = vpop.f32.mrb[7].mxu1  ;;  %v1488_v21 = vpop.f32.mrb[11].mxu0 }
 0x32d   : > { %1502 = vmatmul.mubr.msk.bf16.vlgmr.msra.gmra.mrb[12].mxu0 %vm724_vm2, %v834_v18  ;;  %1510 = vmatmul.mubr.msk.bf16.vlgmr.msra.gmra.mrb[12].mxu1 %vm724_vm2, %v884_v19 }
 0x32e   : > { %1514 = vmatpush3.bf16.msra.mxu0 %v1614_v17  ;;  %1517 = vmatprep.mubr.msk.bf16.mxu0 %vm1791_vm0, %v1790_v0 }
 0x32f   : > { %1515 = vmatprep.subr.bf16.mxu0 %v1790_v0  ;;  %1525 = vmatprep.mubr.msk.bf16.mxu1 %vm1791_vm0, %v1790_v0 }
 0x330   : > { %v943_v23 = vpop.f32.mrb[8].mxu1  ;;  %1522 = vmatpush3.bf16.msra.mxu1 %v1616_v29 }
 0x331   : > { %v1495_v24 = vpop.f32.mrb[9].mxu1  ;;  %1523 = vmatprep.subr.bf16.mxu1 %v1790_v0 }
 0x332   : > { %v946_v25 = vpop.f32.mrb[10].mxu1  ;;  %1516 = vmatpush3.bf16.msra.mxu0 %v1615_v22 }
 0x333   : > { %v1496_v28 = vpop.f32.mrb[11].mxu1 }
 0x334   : > { %1524 = vmatpush3.bf16.msra.mxu1 %v1617_v30 }
 0x335   : > { %1518 = vmatmul.mubr.msk.bf16.vlgmr.msra.gmra.mrb[16].mxu0 %vm724_vm2, %v1099_v8 }
 0x400   : > { %v999_v31 = vpop.f32.mrb[12].mxu0  ;;  %v1060_v32 = vpop.f32.mrb[12].mxu1 }
 0x401   : > { %v1000_v33 = vadd.f32 %v999_v31, %v943_v23  ;;  %v1503_v34 = vpop.f32.mrb[13].mxu0  ;;  %v1511_v35 = vpop.f32.mrb[13].mxu1 }
 0x402   : > { %v1002_v36 = vpop.f32.mrb[14].mxu0  ;;  %v1063_v38 = vpop.f32.mrb[14].mxu1 }
 0x403   : > { %v1003_v39 = vadd.f32 %v1002_v36, %v946_v25  ;;  %v1067_v40 = vadd.f32 %v1060_v32, %v1000_v33  ;;  %v1504_v41 = vpop.f32.mrb[15].mxu0  ;;  %v1512_v0 = vpop.f32.mrb[15].mxu1 }
 0x405   : > { %v1076_v42 = vadd.f32 %v1394_v37, %v1067_v40  ;;  %v1068_v43 = vadd.f32 %v1063_v38, %v1003_v39 }
 0x407   : > { %v1395_v44 = vmul.f32 -1.442695, %v1076_v42  ;;  %v1077_v45 = vadd.f32 %v1394_v37, %v1068_v43 }
 0x408   : > { %v1153_v46 = vpop.f32.mrb[16].mxu0 }
 0x409   : > { %1642 = vpow2.f32 %v1395_v44  ;;  %v1396_v47 = vmul.f32 -1.442695, %v1077_v45  ;;  %v1519_v48 = vpop.f32.mrb[17].mxu0 }
 0x40a   : > { %v1156_v49 = vpop.f32.mrb[18].mxu0 }
 0x40b   : > { %1644 = vpow2.f32 %v1396_v47  ;;  %v1520_v50 = vpop.f32.mrb[19].mxu0 }
 0x413   : > { %v1643_v51 = vpop.eup %1642 }
 0x414   : > { %v1084_v52 = vadd.f32 1.0, %v1643_v51 }
 0x415   : > { %v1645_v53 = vpop.eup %1644 }
 0x416   : > { %1646 = vrcp.f32 %v1084_v52  ;;  %v1085_v54 = vadd.f32 1.0, %v1645_v53 }
 0x418   : > { %1648 = vrcp.f32 %v1085_v54 }
 0x420   : > { %v1647_v55 = vpop.eup %1646 }
 0x421   : > { %v1090_v56 = vmul.f32 %v1647_v55, %v1076_v42 }
 0x422   : > { %v1649_v57 = vpop.eup %1648 }
 0x423   : > { %v1091_v58 = vmul.f32 %v1649_v57, %v1077_v45  ;;  %v1092_v59 = vadd.f32 %v1090_v56, %v2043_v26 }
 0x425   : > { %v1093_v60 = vadd.f32 %v1091_v58, %v2045_v27 }
 0x427   : > { %v1094_v61 = vpack.c.bf16 %v1093_v60, %v1092_v59 }
 0x429   : > { %1526 = vmatmul.mubr.msk.bf16.vlgmr.msra.gmra.mrb[16].mxu1 %vm724_vm2, %v1094_v61 }
 0x4fc   : > { %v1209_v62 = vpop.f32.mrb[16].mxu1 }
 0x4fd   : > { %v1210_v1 = vadd.f32 %v1209_v62, %v1153_v46  ;;  %v1527_v2 = vpop.f32.mrb[17].mxu1 }
 0x4fe   : > { %v1212_v3 = vpop.f32.mrb[18].mxu1 }
 0x4ff   : > { %v1223_v4 = vadd.f32 %v1403_v63, %v1210_v1  ;;  %v1213_v5 = vadd.f32 %v1212_v3, %v1156_v49  ;;  %v1528_v6 = vpop.f32.mrb[19].mxu1 }
 0x501   : > { %v1404_v7 = vmul.f32 -1.442695, %v1223_v4  ;;  %v1224_v26 = vadd.f32 %v1403_v63, %v1213_v5 }
 0x503   : > { %1650 = vpow2.f32 %v1404_v7  ;;  %v1405_v27 = vmul.f32 -1.442695, %v1224_v26 }
 0x505   : > { %1652 = vpow2.f32 %v1405_v27 }
 0x50d   : > { %v1651_v8 = vpop.eup %1650 }
 0x50e   : > { %v1231_v9 = vadd.f32 1.0, %v1651_v8 }
 0x50f   : > { %v1653_v10 = vpop.eup %1652 }
 0x510   : > { %1654 = vrcp.f32 %v1231_v9  ;;  %v1232_v11 = vadd.f32 1.0, %v1653_v10 }
 0x512   : > { %1656 = vrcp.f32 %v1232_v11 }
 0x51a   : > { %v1655_v12 = vpop.eup %1654 }
 0x51b   : > { %v1237_v13 = vmul.f32 %v1655_v12, %v1223_v4 }
 0x51c   : > { %v1657_v14 = vpop.eup %1656 }
 0x51d   : > { %1239 = vst.msk [vmem:[%s490_s16] sm:$0xff] %vm547_vm1, %v1237_v13  ;;  %v1238_v15 = vmul.f32 %v1657_v14, %v1224_v26 }
 0x51f   : > { %1240 = vst.msk [vmem:[%s490_s16 + $0x8] sm:$0xff] %vm547_vm1, %v1238_v15 }
 0x520   : > { %1727 = shalt.err (!%p1724_p11)
}
 0x521   : > { %s1728_s21 = scalar_lea.hbm %s2133_s19, 256  ;;  %s1732_s14 = scalar_lea.hbm %s2225_s20, 512 }
 0x522   : > { %p1729_p13 = scmp.ne.s32.totalorder %s2133_s19, %s1728_s21  ;;  %p1733_p6 = scmp.lt.u32.totalorder %s2133_s19, %s2225_s20 }
 0x523   : > { %p1734_p9 = scmp.lt.u32.totalorder %s1732_s14, %s1728_s21  ;;  %p1736_p12 = scmp.lt.u32.totalorder %s1728_s21, %s2133_s19 }
 0x524   : > { %p1730_p5 = pnand %p1729_p13, %p2226_p1 }
 0x525   : > { %p1735_p10 = por %p1734_p9, %p1733_p6 }
 0x526   : > { %p1731_p0 = pneg %p1730_p5 }
 0x527   : > { %p1737_p2 = por %p1736_p12, %p1735_p10 }
 0x529   : > { %p1738_p3 = pnand %p1737_p2, %p1731_p0 }
 0x52b   : > { %1741 = shalt.err (!%p1738_p3)
}
 0x52c   : > { %s1793_s28 = smov 128   ;;  %s1794_s22 = smov 8  }
 0x52d   : > { %1537 = dma.vmem_to_hbm [thread:$0]  (%p2226_p1), %s2135_s23, 256, %s2133_s19, %s2139_s17, %s1793_s28, %s1793_s28, %s1794_s22  }
 0x52e PF: > { %s2227_s29 = sld [smem:[#allocation13_spill]]  ;;  %s2228_s15 = sld [smem:[#allocation11_spill]] }
 0x52f   : > { %s2229_s24 = sld [smem:[#allocation17_spill]] }
 0x534   : > { %p1554_p4 = scmp.ge.s32.totalorder %s2227_s29, 2  ;;  %s1270_s26 = sand.u32 1, %s2228_s15  }
 0x535   : > { %p2230_p7 = scmp.ne.s32.totalorder %s2229_s24, 0  ;;  %s1271_s21 = scalar_lea.sflag [#allocation4], %s1270_s26 }
 0x537   : > { %p1547_p8 = pnand %p1554_p4, %p2230_p7 }
 0x539   : > { %1767 = dma.done.wait (!%p1547_p8), %s1271_s21, 256  }
 0x53a   : > { %1769 = vsyncadd (!%p1547_p8), %s1271_s21, 4294967040  ;;  %s2231_s16 = sld [smem:[#allocation14_spill]]  ;;  %s2232_s27 = sld [smem:[#allocation12_spill]] }
 0x53b   : > { %s2233_s15 = sld [smem:[#allocation15_spill]]  ;;  %s2234_s29 = smov %s1776_s30 }
 0x540   : > { %p26_p11 = scmp.ge.s32.totalorder %s2231_s16, 4   ;;  %s2235_s30 = smov %s2232_s27 }
 0x542   :  { %28 = sbr.rel (!%p26_p11) target bundleno = 7 (0x7), region = 122 }
 0x549   :  { %1276 = vsyncpa [#allocation3], 1 }
 0x54a   :  { %1278 = vsyncpa [#allocation3 + $0x1], 1 }
 0x54b   :  { %1279 = vsyncpa [#allocation6], 1 }
 0x54c   :  { %1280 = vsyncpa [#allocation4], 1 }
 0x54d   :  { %1282 = vsyncpa [#allocation4 + $0x1], 1 }

</bundles_post_ra>
